<compile_context>
chip_gen: v5e
topology: v5e:2x2
jax: 0.10.0
libtpu: 0.0.40
codegen_flags: <defaults>
</compile_context>

<pallas_src>
import functools

import jax
import jax.numpy as jnp
from jax.experimental import pallas as pl
from jax.experimental.pallas import tpu as pltpu


_TARGET_BLOCK_BYTES = 3 << 20     # ~3 MiB VMEM footprint per block (v5e-safe: 4x = 12 MiB)
_SPLIT_THRESHOLD_BYTES = 1 << 20  # force >= 2 grid steps above this (v7x has 2 TensorCores)


def _round_up(x, m):
    return (x + m - 1) // m * m


def _boxes_per_row(M):
    """Boxes per row d (row width C = 4*d lanes) for viewing M boxes as (M//d, 4*d).

    Prefers lane-dense rows (d % 32 == 0  =>  C % 128 == 0) with >= 8 rows (full
    sublanes); otherwise the narrowest lane-dense row; otherwise any divisor with
    >= 128-lane rows and >= 8 rows; otherwise None (caller uses a 1-row view)."""
    mult32 = [d for d in range(32, 513, 32) if M % d == 0]
    for d in sorted(mult32, reverse=True):
        if M // d >= 8:
            return d
    if mult32:
        return mult32[0]
    for d in range(512, 31, -1):
        if M % d == 0 and M // d >= 8:
            return d
    return None


def _clip_boxes_kernel(boxes_ref, out_ref, *, height, width):
    # boxes_ref / out_ref: VMEM (rows, cols) tiles of the flat coordinate stream,
    # cols % 4 == 0, lane layout per row: [x0, y0, x1, y1, x0, y0, x1, y1, ...].
    b = boxes_ref[...]
    dt = b.dtype

    # Move each box's raw y0 onto its coord-2 / coord-3 lanes (XLU slots, idle
    # otherwise).  Rolls stay inside a row; lanes 0/1 of a row never consume the
    # wrapped values, so the wrap-around is harmless.
    y0_c2 = pltpu.roll(b, shift=1, axis=1)
    y0_c3 = pltpu.roll(b, shift=2, axis=1)

    coord = jax.lax.broadcasted_iota(jnp.int32, b.shape, dimension=1) & 3
    is_c3 = coord == 3
    is_hi = coord >= 2                     # coord 2 or 3

    w = jnp.asarray(width, dt)
    h = jnp.asarray(height, dt)
    zero = jnp.zeros((), dt)

    # Folded select chains sharing the same masks; the min-pattern is fully
    # data-independent (constant-foldable).
    src = jnp.where(is_hi, jnp.where(is_c3, y0_c3, y0_c2), b)
    mins = jnp.where(is_hi, jnp.where(is_c3, h, w), zero)

    # One full-tile VPU max, one unmasked lane-dense store:
    #   max(x0,0), max(y0,0), max(y0,W), max(y0,H)
    out_ref[...] = jnp.maximum(src, mins)


@jax.jit
def clip_boxes(boxes, img):
    """boxes: (B, N, 4) float; img: (B, C, H, W). Returns clipped boxes (B, N, 4)."""
    B, N, _ = boxes.shape
    _, _, H, W = img.shape
    M = B * N                       # total boxes
    T = 4 * M                       # total coordinates
    itemsize = boxes.dtype.itemsize

    d = _boxes_per_row(M)
    if d is None:
        # Awkward box counts (no divisor in [32, 512]): single-row view. Still
        # correct; only 1/8 sublane occupancy for this degenerate case.
        R, C = 1, T
    else:
        C = 4 * d
        R = M // d

    flat = boxes.reshape(R, C)      # free, contiguous row-major view
    total_bytes = T * itemsize

    if R > 1:
        if total_bytes <= _SPLIT_THRESHOLD_BYTES:
            row_tile = R            # tiny input: one full-extent block
        else:
            row_bytes = C * itemsize
            row_tile = max(8, (min(_TARGET_BLOCK_BYTES // row_bytes, R) // 8) * 8)
            row_tile = min(row_tile, _round_up(pl.cdiv(R, 2), 8))   # >= 2 steps
        block = (row_tile, C)
        grid = (pl.cdiv(R, row_tile),)
        index_map = lambda i: (i, 0)
    else:
        if total_bytes <= _SPLIT_THRESHOLD_BYTES:
            col_tile = C
        else:
            # Single row: VMEM pads the sublane dim to 8, so budget by footprint.
            col_budget = _TARGET_BLOCK_BYTES // (8 * itemsize)
            col_tile = max(128, (min(col_budget, C) // 128) * 128)
            col_tile = min(col_tile, _round_up(pl.cdiv(C, 2), 128))  # >= 2 steps
        block = (1, col_tile)
        grid = (pl.cdiv(C, col_tile),)
        index_map = lambda i: (0, i)

    kernel = functools.partial(_clip_boxes_kernel, height=H, width=W)

    out = pl.pallas_call(
        kernel,
        out_shape=jax.ShapeDtypeStruct((R, C), boxes.dtype),
        grid=grid,
        in_specs=[pl.BlockSpec(block, index_map)],
        out_specs=pl.BlockSpec(block, index_map),
        compiler_params=pltpu.CompilerParams(
            dimension_semantics=("parallel",)),
    )(flat)

    return out.reshape(B, N, 4)


def _clip_boxes_ref(boxes, img):
    """Pure-JAX reference reproducing the PyTorch in-place semantics."""
    _, _, H, W = img.shape
    x0 = jnp.maximum(boxes[:, :, 0], 0.0)
    y0 = jnp.maximum(boxes[:, :, 1], 0.0)
    x1 = jnp.maximum(y0, float(W))
    y1 = jnp.maximum(y0, float(H))
    return jnp.stack([x0, y0, x1, y1], axis=-1)


if __name__ == "__main__":
    key = jax.random.PRNGKey(0)
    k1, k2 = jax.random.split(key)

    B, N = 2, 32
    Cc, H, W = 4, 16, 16

    # Boxes with a mix of negative / in-range / large coordinates.
    boxes = jax.random.uniform(k1, (B, N, 4), jnp.float32, minval=-10.0, maxval=30.0)
    img = jax.random.normal(k2, (B, Cc, H, W), jnp.float32)

    out = jax.block_until_ready(clip_boxes(boxes, img))

    ref = _clip_boxes_ref(boxes, img)
    assert out.shape == boxes.shape and out.dtype == boxes.dtype
    assert jnp.allclose(out, ref, atol=1e-6), "mismatch vs reference"

    print("KERNEL_OK")
</pallas_src>

<mosaic_0001>
module attributes {stable_mosaic.version = 11 : i64} {
  func.func @_clip_boxes_kernel(%arg0: i32, %arg1: memref<2x128xf32, #tpu.memory_space<vmem>>, %arg2: memref<2x128xf32, #tpu.memory_space<vmem>>) attributes {dimension_semantics = [#tpu.dimension_semantics<parallel>], iteration_bounds = array<i64: 1>, scalar_prefetch = 0 : i64, scratch_operands = 0 : i64, tpu.core_type = #tpu.core_type<tc>, window_params = [{transform_indices = @transform_0, window_bounds = array<i64: 2, 128>}, {transform_indices = @transform_1, window_bounds = array<i64: 2, 128>}]} {
    %c0 = arith.constant 0 : index
    %c0_0 = arith.constant 0 : index
    %0 = vector.load %arg1[%c0, %c0_0] : memref<2x128xf32, #tpu.memory_space<vmem>>, vector<2x128xf32>
    %c1_i32 = arith.constant 1 : i32
    %1 = tpu.dynamic_rotate %0 by %c1_i32 dim 1 : vector<2x128xf32>, i32 -> vector<2x128xf32>
    %c2_i32 = arith.constant 2 : i32
    %2 = tpu.dynamic_rotate %0 by %c2_i32 dim 1 : vector<2x128xf32>, i32 -> vector<2x128xf32>
    %3 = tpu.iota {dimensions = array<i32: 1>} : vector<2x128xi32>
    %c3_i32 = arith.constant 3 : i32
    %4 = vector.broadcast %c3_i32 : i32 to vector<2x128xi32>
    %5 = arith.andi %3, %4 : vector<2x128xi32>
    %c3_i32_1 = arith.constant 3 : i32
    %6 = vector.broadcast %c3_i32_1 : i32 to vector<2x128xi32>
    %7 = arith.cmpi eq, %5, %6 : vector<2x128xi32>
    %c2_i32_2 = arith.constant 2 : i32
    %8 = vector.broadcast %c2_i32_2 : i32 to vector<2x128xi32>
    %9 = arith.cmpi sge, %5, %8 : vector<2x128xi32>
    %10 = arith.select %7, %2, %1 : vector<2x128xi1>, vector<2x128xf32>
    %11 = arith.select %9, %10, %0 : vector<2x128xi1>, vector<2x128xf32>
    %cst = arith.constant 1.600000e+01 : f32
    %cst_3 = arith.constant 1.600000e+01 : f32
    %12 = vector.broadcast %cst : f32 to vector<2x128xf32>
    %13 = vector.broadcast %cst_3 : f32 to vector<2x128xf32>
    %14 = arith.select %7, %12, %13 : vector<2x128xi1>, vector<2x128xf32>
    %cst_4 = arith.constant 0.000000e+00 : f32
    %15 = vector.broadcast %cst_4 : f32 to vector<2x128xf32>
    %16 = arith.select %9, %14, %15 : vector<2x128xi1>, vector<2x128xf32>
    %17 = arith.maximumf %11, %16 : vector<2x128xf32>
    %c0_5 = arith.constant 0 : index
    %c0_6 = arith.constant 0 : index
    %18 = vector.load %arg2[%c0_5, %c0_6] : memref<2x128xf32, #tpu.memory_space<vmem>>, vector<2x128xf32>
    tpu.vector_store %arg2[%c0_5, %c0_6], %17 {strides = array<i32>} : memref<2x128xf32, #tpu.memory_space<vmem>>, vector<2x128xf32>,
    return
  }
  func.func @transform_0(%arg0: i32) -> (i32, i32) {
    %c0_i32 = arith.constant 0 : i32
    %c0_i32_0 = arith.constant 0 : i32
    return %arg0, %c0_i32 : i32, i32
  }
  func.func @transform_1(%arg0: i32) -> (i32, i32) {
    %c0_i32 = arith.constant 0 : i32
    %c0_i32_0 = arith.constant 0 : i32
    return %arg0, %c0_i32 : i32, i32
  }
}

</mosaic_0001>

<bundles_post_ra>
// kernel: clip_boxes.1
= control target key start
LH: loop header
LB: loop body
LE: loop exit
PB: predicated region body
PF: predicated region fallthrough
CT: control target
= control target key end

     0   :  { %s30_s8 = smov 1   ;;  %s31_s9 = smov 2   ;;  %v13_v1 = vlaneseq  ;;  %v32_v5 = vmov 0.0   ;;  %s49_s0 = inlined_call_operand.vmem [shape: f32[2,128], index: 0, kind: input, shape index: {}]   ;;  %s50_s1 = inlined_call_operand.vmem [shape: f32[2,128], index: 1, kind: output, shape index: {}]  }
   0x1   :  { %v8_v0 = vld [vmem:[%s49_s0] sm:$0x3] }
   0x2   :  { %9 = vrot.lane.b32.xlu0 %v8_v0, %s30_s8  ;;  %v14_v2 = vand.u32 127, %v13_v1 }
   0x4   :  { %v15_v4 = vand.u32 3, %v14_v2 }
   0x6   :  { %vm17_vm0 = vcmp.ge.s32.totalorder %v15_v4, 2  ;;  %vm16_vm1 = vcmp.eq.s32.totalorder %v15_v4, 3 }
   0x7   :  { %v20_v6 = vsel %vm17_vm0, 16.0, %v32_v5 }
   0xa   :  { %11 = vrot.lane.b32.xlu0 %v8_v0, %s31_s9 }
  0x74   :  { %v10_v3 = vpop.permute.xlu0 %9 }
  0x7c   :  { %v12_v7 = vpop.permute.xlu0 %11 }
  0x7d   :  { %v18_v8 = vsel %vm16_vm1, %v12_v7, %v10_v3 }
  0x7e   :  { %v19_v9 = vsel %vm17_vm0, %v18_v8, %v8_v0 }
  0x7f   :  { %v21_v10 = vmax.f32 %v19_v9, %v20_v6 }
  0x81   :  { %22 = vst [vmem:[%s50_s1] sm:$0x3] %v21_v10 }

</bundles_post_ra>
